<compile_context>
chip_gen: v7x
topology: tpu7x:2x2x1
jax: 0.10.0
libtpu: 0.0.40
codegen_flags: <defaults>
</compile_context>

<pallas_src>
import jax
import jax.numpy as jnp
from jax.experimental import pallas as pl
from jax.experimental.pallas import tpu as pltpu


LANE = 128   # lane width: pad the 2-class dim up to this -> unmasked vst stores
SUB = 16     # row-tile granularity (covers bf16 sublane packing of the output)


def _round_up(a, b):
    return ((a + b - 1) // b) * b


def _head_kernel(x_ref, w1_ref, b1_ref, w2_ref, b2_ref, o_ref):
    # x_ref : (tm, 2H)  native dtype (f32) -- cast here, in VMEM
    # w1_ref: (2H, H)   compute dtype (bf16)
    # b1_ref: (1, H)    f32
    # w2_ref: (H, 128)  compute dtype, zero-padded beyond class 2
    # b2_ref: (1, 128)  f32, zero-padded beyond class 2
    # o_ref : (tm, 128) bf16
    x = x_ref[...].astype(w1_ref.dtype)
    h = jnp.dot(x, w1_ref[...], preferred_element_type=jnp.float32)
    # Bias add in f32; tanh on the bf16 value (needed in bf16 for the 2nd
    # matmul anyway).  On v5e the compiler upcasts the bf16 tanh transparently.
    h = jnp.tanh((h + b1_ref[...]).astype(w2_ref.dtype))
    out = jnp.dot(h, w2_ref[...], preferred_element_type=jnp.float32)
    o_ref[...] = (out + b2_ref[...]).astype(o_ref.dtype)


def prepare_head_params(w1, b1, w2, b2, *, compute_dtype=jnp.bfloat16):
    """One-time weight prep (cast + lane padding). Cache the result and reuse
    it across forward calls instead of re-running this per invocation."""
    K, N1 = w1.shape                 # K = 2H, N1 = H
    N2 = w2.shape[-1]                # number of classes (2)
    n2p = _round_up(max(N2, 1), LANE)

    w1_c = w1.astype(compute_dtype)
    w2_p = jnp.zeros((N1, n2p), dtype=compute_dtype).at[:, :N2].set(
        w2.astype(compute_dtype))
    b1_2d = b1.reshape(1, N1).astype(jnp.float32)
    b2_p = jnp.zeros((1, n2p), dtype=jnp.float32).at[0, :N2].set(
        b2.astype(jnp.float32))
    return {"w1": w1_c, "b1": b1_2d, "w2": w2_p, "b2": b2_p, "n_classes": N2}


def roberta_classification_head(x, params, *, row_tile=512):
    """x: [..., H]; params from prepare_head_params().  Returns [M, 2] f32,
    M = prod(leading dims) * H // (2H), matching the torch reshape(-1, 2H)."""
    w1, b1, w2, b2 = params["w1"], params["b1"], params["w2"], params["b2"]
    n_classes = params["n_classes"]
    K, N1 = w1.shape
    n2p = w2.shape[-1]
    H = x.shape[-1]
    assert K == 2 * H, (K, H)

    x2d = x.reshape(-1, K)           # same as torch x.reshape(-1, 2H)
    M = x2d.shape[0]

    # Large row tile, multiple of SUB, and <= ceil(M/2) so the parallel grid
    # axis has >= 2 steps where possible (v7x megacore uses both TCs).
    # (row_tile=1024 is a reasonable bump on 128 MiB-VMEM parts, v5e/v6e.)
    tm = max(SUB, min(row_tile, _round_up(pl.cdiv(M, 2), SUB)))
    grid = (pl.cdiv(M, tm),)         # last block may over-run: OOB reads are
                                     # garbage rows, their writes are dropped.

    x_bytes = jnp.dtype(x2d.dtype).itemsize
    w_bytes = jnp.dtype(w1.dtype).itemsize
    cost = pl.CostEstimate(
        flops=2 * M * K * N1 + 2 * M * N1 * n2p,
        transcendentals=M * N1,
        bytes_accessed=(M * K * x_bytes          # x streamed once, native dtype
                        + K * N1 * w_bytes       # W1 (resident)
                        + N1 * n2p * w_bytes     # W2 (resident, lane-padded)
                        + (N1 + n2p) * 4         # biases (f32)
                        + M * n2p * 2),          # bf16 output slab
    )

    out_full = pl.pallas_call(
        _head_kernel,
        out_shape=jax.ShapeDtypeStruct((M, n2p), jnp.bfloat16),
        grid=grid,
        in_specs=[
            pl.BlockSpec((tm, K), lambda i: (i, 0)),     # x rows (streamed)
            # Constant index maps keep the weights resident in VMEM (Pallas
            # skips the DMA when the block index does not change).
            # TODO(synk): pipeline_mode=pl.Buffered(1) on these four specs
            # would also drop their unused second pipeline buffer at large H.
            pl.BlockSpec((K, N1), lambda i: (0, 0)),     # W1
            pl.BlockSpec((1, N1), lambda i: (0, 0)),     # b1
            pl.BlockSpec((N1, n2p), lambda i: (0, 0)),   # W2 (lane-padded)
            pl.BlockSpec((1, n2p), lambda i: (0, 0)),    # b2
        ],
        out_specs=pl.BlockSpec((tm, n2p), lambda i: (i, 0)),
        compiler_params=pltpu.CompilerParams(
            dimension_semantics=("parallel",),
            vmem_limit_bytes=32 * 1024 * 1024,
        ),
        cost_estimate=cost,
    )(x2d, w1, b1, w2, b2)

    # Tiny slice of the lane-padded slab; restore f32 logits for the caller.
    return out_full[:, :n_classes].astype(jnp.float32)


def reference_head(x, w1, b1, w2, b2):
    H = x.shape[-1]
    x2d = x.reshape(-1, 2 * H).astype(jnp.float32)
    h = jnp.tanh(x2d @ w1 + b1)
    return h @ w2 + b2


if __name__ == "__main__":
    # Small config: hidden_size = 32
    HIDDEN = 32
    B, S = 2, 8                       # x: [2, 8, 32] -> reshaped to [8, 64]

    key = jax.random.PRNGKey(0)
    kx, kw1, kb1, kw2, kb2 = jax.random.split(key, 5)

    x = jax.random.normal(kx, (B, S, HIDDEN), dtype=jnp.float32)

    # Deterministic param init (PyTorch-Linear-style uniform bounds).
    fan1 = 2 * HIDDEN
    bound1 = 1.0 / jnp.sqrt(fan1)
    w1 = jax.random.uniform(kw1, (fan1, HIDDEN), minval=-bound1, maxval=bound1,
                            dtype=jnp.float32)      # dense.weight.T
    b1 = jax.random.uniform(kb1, (HIDDEN,), minval=-bound1, maxval=bound1,
                            dtype=jnp.float32)

    fan2 = HIDDEN
    bound2 = 1.0 / jnp.sqrt(fan2)
    w2 = jax.random.uniform(kw2, (fan2, 2), minval=-bound2, maxval=bound2,
                            dtype=jnp.float32)      # out_proj.weight.T
    b2 = jax.random.uniform(kb2, (2,), minval=-bound2, maxval=bound2,
                            dtype=jnp.float32)

    # One-time weight preparation (hoisted out of the per-call path).
    params = prepare_head_params(w1, b1, w2, b2)

    out = roberta_classification_head(x, params)
    out = jax.block_until_ready(out)

    ref = reference_head(x, w1, b1, w2, b2)
    assert out.shape == (B * S // 2, 2), out.shape
    # bf16 MXU operands + bf16 tanh + bf16 output slab (f32 accumulation):
    # loosen tolerance vs. the f32 reference accordingly.
    assert jnp.allclose(out, ref, atol=3e-2, rtol=3e-2), "mismatch vs reference"

    print("KERNEL_OK")
</pallas_src>

<mosaic_0001>
module attributes {stable_mosaic.version = 11 : i64} {
  func.func @_head_kernel(%arg0: i32, %arg1: memref<16x64xf32, #tpu.memory_space<vmem>>, %arg2: memref<64x32xbf16, #tpu.memory_space<vmem>>, %arg3: memref<1x32xf32, #tpu.memory_space<vmem>>, %arg4: memref<32x128xbf16, #tpu.memory_space<vmem>>, %arg5: memref<1x128xf32, #tpu.memory_space<vmem>>, %arg6: memref<16x128xbf16, #tpu.memory_space<vmem>>) attributes {dimension_semantics = [#tpu.dimension_semantics<parallel>], iteration_bounds = array<i64: 1>, scalar_prefetch = 0 : i64, scratch_operands = 0 : i64, tpu.core_type = #tpu.core_type<tc>, window_params = [{transform_indices = @transform_0, window_bounds = array<i64: 16, 64>}, {pipeline_mode = #tpu.pipeline_mode<synchronous>, transform_indices = @transform_1, window_bounds = array<i64: 64, 32>}, {pipeline_mode = #tpu.pipeline_mode<synchronous>, transform_indices = @transform_2, window_bounds = array<i64: 1, 32>}, {pipeline_mode = #tpu.pipeline_mode<synchronous>, transform_indices = @transform_3, window_bounds = array<i64: 32, 128>}, {pipeline_mode = #tpu.pipeline_mode<synchronous>, transform_indices = @transform_4, window_bounds = array<i64: 1, 128>}, {transform_indices = @transform_5, window_bounds = array<i64: 16, 128>}]} {
    %c0 = arith.constant 0 : index
    %c0_0 = arith.constant 0 : index
    %0 = vector.load %arg1[%c0, %c0_0] : memref<16x64xf32, #tpu.memory_space<vmem>>, vector<16x64xf32>
    %1 = arith.truncf %0 : vector<16x64xf32> to vector<16x64xbf16>
    %c0_1 = arith.constant 0 : index
    %c0_2 = arith.constant 0 : index
    %2 = vector.load %arg2[%c0_1, %c0_2] : memref<64x32xbf16, #tpu.memory_space<vmem>>, vector<64x32xbf16>
    %cst = arith.constant dense<0.000000e+00> : vector<16x32xf32>
    %3 = tpu.matmul %1, %2, %cst {dimension_numbers = #tpu.dot_dimension_numbers<[1], [0], [0], [1], [0, 0, 1, 1], [], []>} : vector<16x64xbf16>, vector<64x32xbf16>, vector<16x32xf32> -> vector<16x32xf32>
    %c0_3 = arith.constant 0 : index
    %c0_4 = arith.constant 0 : index
    %4 = vector.load %arg3[%c0_3, %c0_4] : memref<1x32xf32, #tpu.memory_space<vmem>>, vector<1x32xf32>
    %5 = vector.broadcast %4 : vector<1x32xf32> to vector<16x32xf32>
    %6 = arith.addf %3, %5 : vector<16x32xf32>
    %7 = arith.truncf %6 : vector<16x32xf32> to vector<16x32xbf16>
    %8 = math.tanh %7 : vector<16x32xbf16>
    %c0_5 = arith.constant 0 : index
    %c0_6 = arith.constant 0 : index
    %9 = vector.load %arg4[%c0_5, %c0_6] : memref<32x128xbf16, #tpu.memory_space<vmem>>, vector<32x128xbf16>
    %cst_7 = arith.constant dense<0.000000e+00> : vector<16x128xf32>
    %10 = tpu.matmul %8, %9, %cst_7 {dimension_numbers = #tpu.dot_dimension_numbers<[1], [0], [0], [1], [0, 0, 1, 1], [], []>} : vector<16x32xbf16>, vector<32x128xbf16>, vector<16x128xf32> -> vector<16x128xf32>
    %c0_8 = arith.constant 0 : index
    %c0_9 = arith.constant 0 : index
    %11 = vector.load %arg5[%c0_8, %c0_9] : memref<1x128xf32, #tpu.memory_space<vmem>>, vector<1x128xf32>
    %12 = vector.broadcast %11 : vector<1x128xf32> to vector<16x128xf32>
    %13 = arith.addf %10, %12 : vector<16x128xf32>
    %14 = arith.truncf %13 : vector<16x128xf32> to vector<16x128xbf16>
    %c0_10 = arith.constant 0 : index
    %c0_11 = arith.constant 0 : index
    %15 = vector.load %arg6[%c0_10, %c0_11] : memref<16x128xbf16, #tpu.memory_space<vmem>>, vector<16x128xbf16>
    tpu.vector_store %arg6[%c0_10, %c0_11], %14 {strides = array<i32>} : memref<16x128xbf16, #tpu.memory_space<vmem>>, vector<16x128xbf16>,
    return
  }
  func.func @transform_0(%arg0: i32) -> (i32, i32) {
    %c0_i32 = arith.constant 0 : i32
    %c0_i32_0 = arith.constant 0 : i32
    return %arg0, %c0_i32 : i32, i32
  }
  func.func @transform_1(%arg0: i32) -> (i32, i32) {
    %c0_i32 = arith.constant 0 : i32
    %c0_i32_0 = arith.constant 0 : i32
    %c0_i32_1 = arith.constant 0 : i32
    return %c0_i32, %c0_i32_0 : i32, i32
  }
  func.func @transform_2(%arg0: i32) -> (i32, i32) {
    %c0_i32 = arith.constant 0 : i32
    %c0_i32_0 = arith.constant 0 : i32
    %c0_i32_1 = arith.constant 0 : i32
    return %c0_i32, %c0_i32_0 : i32, i32
  }
  func.func @transform_3(%arg0: i32) -> (i32, i32) {
    %c0_i32 = arith.constant 0 : i32
    %c0_i32_0 = arith.constant 0 : i32
    %c0_i32_1 = arith.constant 0 : i32
    return %c0_i32, %c0_i32_0 : i32, i32
  }
  func.func @transform_4(%arg0: i32) -> (i32, i32) {
    %c0_i32 = arith.constant 0 : i32
    %c0_i32_0 = arith.constant 0 : i32
    %c0_i32_1 = arith.constant 0 : i32
    return %c0_i32, %c0_i32_0 : i32, i32
  }
  func.func @transform_5(%arg0: i32) -> (i32, i32) {
    %c0_i32 = arith.constant 0 : i32
    %c0_i32_0 = arith.constant 0 : i32
    return %arg0, %c0_i32 : i32, i32
  }
}

</mosaic_0001>

<bundles_post_ra>
// kernel: tpu_custom_call.1
= control target key start
LH: loop header
LB: loop body
LE: loop exit
PB: predicated region body
PF: predicated region fallthrough
CT: control target
= control target key end

     0   :  { %10 = vsyncpa [#allocation3], 0  ;;  %v289_v1 = vmov 0.0   ;;  %vm290_vm0 = vmmov 0   ;;  %vm64_vm1 = vcmask 523264   ;;  %vm134_vm2 = vcmask 261120   ;;  %s366_s0 = inlined_call_operand.vmem [shape: f32[8,64], index: 0, kind: input, shape index: {}]   ;;  %s367_s1 = inlined_call_operand.vmem [shape: bf16[64,32], index: 1, kind: input, shape index: {}]   ;;  %s368_s2 = inlined_call_operand.vmem [shape: f32[1,32], index: 2, kind: input, shape index: {}]   ;;  %s369_s3 = inlined_call_operand.vmem [shape: bf16[32,128], index: 3, kind: input, shape index: {}]   ;;  %s370_s4 = inlined_call_operand.vmem [shape: f32[1,128], index: 4, kind: input, shape index: {}]   ;;  %s371_s5 = inlined_call_operand.hbm [shape: bf16[8,128], index: 5, kind: output, shape index: {}]  }
   0x1   :  { %v257_v0 = vld [vmem:[%s367_s1] sm:$0xff]   ;;  %232 = vmatprep.subr.bf16.mxu0 %v289_v1  ;;  %244 = vmatprep.subr.bf16.mxu1 %v289_v1  ;;  %v258_v2 = vld [vmem:[%s367_s1 + $0x8] sm:$0xff]   ;;  %v259_v3 = vld [vmem:[%s367_s1 + $0x10] sm:$0xff]  }
   0x2   :  { %233 = vmatpush3.bf16.msra.mxu0 %v257_v0  ;;  %240 = vmatprep.mubr.msk.bf16.mxu0 %vm290_vm0, %v289_v1  ;;  %v260_v4 = vld [vmem:[%s367_s1 + $0x18] sm:$0xff]   ;;  %v22_v5 = vld [vmem:[%s366_s0] sm:$0xff]  ;;  %v23_v6 = vld [vmem:[%s366_s0 + $0x8] sm:$0xff] }
   0x3   :  { %234 = vmatprep.subr.bf16.mxu0 %v289_v1  ;;  %248 = vmatprep.mubr.msk.bf16.mxu1 %vm290_vm0, %v289_v1  ;;  %v24_v7 = vpack.c.bf16 %v23_v6, %v22_v5  ;;  %v261_v8 = vld [vmem:[%s369_s3] sm:$0xff]   ;;  %v262_v9 = vld [vmem:[%s369_s3 + $0x8] sm:$0xff]  }
   0x4   :  { %245 = vmatpush3.bf16.msra.mxu1 %v261_v8  ;;  %v205_v10 = vld [vmem:[%s368_s2] ss:$0 sm:$0xff] }
   0x5   :  { %246 = vmatprep.subr.bf16.mxu1 %v289_v1  ;;  %v211_v19 = vld [vmem:[%s370_s4] ss:$0 sm:$0xff] }
   0x6   :  { %235 = vmatpush3.bf16.msra.mxu0 %v258_v2 }
   0x7   :  { %236 = vmatprep.subr.bf16.mxu0 %v289_v1 }
   0x8   :  { %247 = vmatpush3.bf16.msra.mxu1 %v262_v9 }
   0xa   :  { %237 = vmatpush3.bf16.msra.mxu0 %v259_v3 }
   0xb   :  { %238 = vmatprep.subr.bf16.mxu0 %v289_v1 }
   0xe   :  { %239 = vmatpush3.bf16.msra.mxu0 %v260_v4 }
  0x11   :  { %241 = vmatmul.mubr.msk.bf16.vlgmr.msra.gmra.mrb[0].mxu0 %vm64_vm1, %v24_v7 }
  0xe4   :  { %v102_v11 = vpop.f32.mrb[0].mxu0 }
  0xe5   :  { %v242_v12 = vpop.f32.mrb[1].mxu0  ;;  %v103_v14 = vadd.f32 %v205_v10, %v102_v11 }
  0xe6   :  { %v105_v13 = vpop.f32.mrb[2].mxu0 }
  0xe7   :  { %v106_v15 = vadd.f32 %v205_v10, %v105_v13  ;;  %v243_v16 = vpop.f32.mrb[3].mxu0 }
  0xe9   :  { %v109_v17 = vpack.c.bf16 %v106_v15, %v103_v14 }
  0xeb   :  { %263 = vtanh.bf16 %v109_v17 }
  0xf6   :  { %v264_v18 = vpop.eup %263 }
  0xf7   :  { %249 = vmatmul.mubr.msk.bf16.vlgmr.msra.gmra.mrb[0].mxu1 %vm134_vm2, %v264_v18 }
 0x1ca   :  { %v172_v20 = vpop.f32.mrb[0].mxu1 }
 0x1cb   :  { %v250_v21 = vpop.f32.mrb[1].mxu1  ;;  %v173_v23 = vadd.f32 %v211_v19, %v172_v20 }
 0x1cc   :  { %v175_v22 = vpop.f32.mrb[2].mxu1 }
 0x1cd   :  { %v176_v24 = vadd.f32 %v211_v19, %v175_v22  ;;  %v251_v25 = vpop.f32.mrb[3].mxu1 }
 0x1cf   :  { %v222_v26 = vpack.c.bf16 %v176_v24, %v173_v23 }
 0x1d1   :  { %223 = vst [vmem:[#allocation2] sm:$0xff] %v222_v26  }
 0x1d2   :  { %193 = vsyncadd [#allocation3], 64  ;;  %s291_s2 = smov [#allocation2]  }
 0x1d3   :  { %s194_s3 = sshll.u32 %s291_s2, 4  ;;  %s195_s3 = int_to_ptr.vmem [resolvable:$true] %s194_s3 }
 0x1d4   :  { %s265_s11 = scalar_lea.vmem %s195_s3, 64  ;;  %s269_s12 = scalar_lea.vmem %s195_s3, 128 }
 0x1d5   :  { %p266_p0 = scmp.ne.s32.totalorder %s195_s3, %s265_s11  ;;  %p270_p1 = scmp.lt.s32.totalorder %s195_s3, %s195_s3 }
 0x1d6   :  { %p271_p2 = scmp.lt.s32.totalorder %s269_s12, %s265_s11 }
 0x1d8   :  { %p272_p3 = por %p271_p2, %p270_p1 }
 0x1da   :  { %p273_p4 = pnand %p272_p3, %p266_p0 }
 0x1dc   :  { %276 = shalt.err (!%p273_p4)
}
 0x1dd   :  { %s277_s14 = scalar_lea.hbm %s371_s5, 64 }
 0x1de   :  { %p278_p5 = scmp.ne.s32.totalorder %s371_s5, %s277_s14  ;;  %p281_p6 = scmp.lt.u32.totalorder %s277_s14, %s371_s5 }
 0x1e0   :  { %p283_p7 = pnand %p281_p6, %p278_p5 }
 0x1e2   :  { %286 = shalt.err (!%p283_p7)
}
 0x1e3   :  { %s292_s19 = smov 64   ;;  %s293_s20 = smov 4  }
 0x1e4   :  { %200 = dma.vmem_to_hbm [thread:$0]  %s195_s3, 64, %s371_s5, [#allocation3], %s292_s19, %s292_s19, %s293_s20  }
 0x1e5   :  { %287 = dma.done.wait [#allocation3], 128  }
 0x1e6   :  { %288 = vsyncadd [#allocation3], 4294967168 }
 0x1e7   :  { %204 = vsyncpa [#allocation3], 1 }

</bundles_post_ra>
